<compile_context>
chip_gen: v6e
topology: v6e:2x2x1
jax: 0.10.0
libtpu: 0.0.40
codegen_flags: <defaults>
</compile_context>

<pallas_src>
import functools

import jax
import jax.numpy as jnp
from jax import lax
from jax.experimental import pallas as pl
from jax.experimental.pallas import tpu as pltpu


def _attention_kernel(dec_bias_ref, enc_ref, w_enc_ref, out_ref, scores_ref, *,
                      ts, bt, two_e, s_len, s_total, use_bf16_matmul):
    # dec_bias_ref: [BT, A]   (dec_h @ Wdec + bias, hoisted; grid-invariant over S)
    # enc_ref     : [TS, BT*2E]   (native-layout tile, lanes = batch-major features)
    # w_enc_ref   : [2E, A]
    # out_ref     : [BT, S_total] (resident across the S grid axis; written at last S block)
    # scores_ref  : VMEM scratch [S_total, BT]
    s = pl.program_id(1)

    w = w_enc_ref[...]
    if use_bf16_matmul:
        w = w.astype(jnp.bfloat16)

    cols = []
    for b in range(bt):                                   # static unroll, BT <= 8
        xb = enc_ref[:, b * two_e:(b + 1) * two_e]        # [TS, 2E]
        if use_bf16_matmul:
            xb = xb.astype(jnp.bfloat16)
        proj = jnp.dot(xb, w, preferred_element_type=jnp.float32)      # [TS, A] MXU, M=TS
        energy = jnp.tanh(proj + dec_bias_ref[b:b + 1, :])             # f32 elementwise
        cols.append(jnp.sum(energy, axis=1, keepdims=True))            # [TS, 1]
    scores = jnp.concatenate(cols, axis=1)                # [TS, BT]

    if s_total != s_len:                                  # mask padded/ragged src rows
        row = s * ts + lax.broadcasted_iota(jnp.int32, (ts, bt), 0)
        scores = jnp.where(row < s_len, scores, -jnp.inf)

    start = pl.multiple_of(s * ts, 8)
    scores_ref[pl.ds(start, ts), :] = scores

    @pl.when(s == pl.num_programs(1) - 1)
    def _finalize():
        all_scores = scores_ref[...]                      # [S_total, BT]
        m = jnp.max(all_scores, axis=0, keepdims=True)
        e = jnp.exp(all_scores - m)
        denom = jnp.sum(e, axis=0, keepdims=True)
        # approx=True would push the divide to the (idle) EUP but loosens sum-to-one.
        probs = e * pl.reciprocal(denom, approx=False)
        out_ref[...] = jnp.transpose(probs).astype(out_ref.dtype)      # [BT, S_total]


def _round_up(x, m):
    return ((x + m - 1) // m) * m


def attention_forward(decoder_hidden, encoder_outputs, weight, bias, *,
                      s_tile=512, b_tile=None, use_bf16_matmul=False):
    """decoder_hidden: [B, Ddec]; encoder_outputs: [S, B, 2E] (native PyTorch layout);
    weight: [A, Ddec + 2E] (nn.Linear layout); bias: [A]. Returns softmax [B, S]."""
    S, B, two_e = encoder_outputs.shape
    d_dec = decoder_hidden.shape[1]
    A = weight.shape[0]
    assert weight.shape[1] == d_dec + two_e

    # ---- grid-invariant work hoisted to the wrapper (tiny) --------------------------------
    w_t = weight.T.astype(jnp.float32)                    # [Ddec+2E, A]
    w_dec = w_t[:d_dec, :]                                # acts on decoder_hidden
    w_enc = w_t[d_dec:, :]                                # acts on encoder_outputs
    dec_bias = (jnp.dot(decoder_hidden.astype(jnp.float32), w_dec,
                        preferred_element_type=jnp.float32)
                + bias.astype(jnp.float32)[None, :])      # [B, A]

    # zero-copy view of the native layout: [S, B, 2E] -> [S, B*2E] (no HBM transpose/copy)
    enc2d = encoder_outputs.reshape(S, B * two_e)

    # ---- tiling ----------------------------------------------------------------------------
    if S <= 8:
        TS = S
    else:
        TS = max(8, (min(s_tile, S) // 8) * 8)            # multiple of 8, <= S
    NS = pl.cdiv(S, TS)
    S_total = NS * TS                                     # ragged last S block masked in-kernel

    if b_tile is None:
        BT = B if B <= 8 else 8
    else:
        BT = min(b_tile, B)
    if BT != B and (BT % 8 != 0 or (BT * two_e) % 128 != 0):
        BT = B                                            # layout-safe fallback: one batch block
    NB = pl.cdiv(B, BT)

    kernel = functools.partial(
        _attention_kernel, ts=TS, bt=BT, two_e=two_e, s_len=S, s_total=S_total,
        use_bf16_matmul=use_bf16_matmul)

    out = pl.pallas_call(
        kernel,
        out_shape=jax.ShapeDtypeStruct((B, S_total), jnp.float32),
        grid_spec=pltpu.PrefetchScalarGridSpec(
            num_scalar_prefetch=0,
            grid=(NB, NS),
            in_specs=[
                pl.BlockSpec((BT, A), lambda b, s: (b, 0)),            # dec_bias (resident/b)
                pl.BlockSpec((TS, BT * two_e), lambda b, s: (s, b)),   # enc tile (pipelined)
                pl.BlockSpec((two_e, A), lambda b, s: (0, 0)),         # w_enc (resident)
            ],
            out_specs=pl.BlockSpec((BT, S_total), lambda b, s: (b, 0)),
            scratch_shapes=[pltpu.VMEM((S_total, BT), jnp.float32)],
        ),
        compiler_params=pltpu.CompilerParams(
            dimension_semantics=("parallel", "arbitrary"),
            vmem_limit_bytes=32 * 1024 * 1024,
        ),
    )(dec_bias, enc2d, w_enc)
    return out[:, :S]


def attention_reference(decoder_hidden, encoder_outputs, weight, bias):
    """Pure-JAX reference mirroring the PyTorch forward."""
    S = encoder_outputs.shape[0]
    rep_dec = jnp.repeat(decoder_hidden[:, None, :], S, axis=1)       # [B, S, Ddec]
    enc_bm = jnp.transpose(encoder_outputs, (1, 0, 2))                # [B, S, 2E]
    cat = jnp.concatenate([rep_dec, enc_bm], axis=2)                  # [B, S, attn_in]
    energy = jnp.tanh(jnp.einsum("bsi,ai->bsa", cat, weight) + bias)  # [B, S, A]
    scores = jnp.sum(energy, axis=2)                                  # [B, S]
    return jax.nn.softmax(scores, axis=1)


if __name__ == "__main__":
    def make_inputs(key, B, S, enc_hid, dec_hid, attn_dim):
        attn_in = 2 * enc_hid + dec_hid
        k1, k2, k3, k4 = jax.random.split(key, 4)
        dec_h = jax.random.normal(k1, (B, dec_hid), dtype=jnp.float32)
        enc = jax.random.normal(k2, (S, B, 2 * enc_hid), dtype=jnp.float32)
        bound = 1.0 / (attn_in ** 0.5)
        w = jax.random.uniform(k3, (attn_dim, attn_in), jnp.float32, -bound, bound)
        b = jax.random.uniform(k4, (attn_dim,), jnp.float32, -bound, bound)
        return dec_h, enc, w, b

    # Small shapes consistent with the module.
    B, S, enc_hid, dec_hid, attn_dim = 2, 8, 16, 32, 32
    dec_h, enc, w, b = make_inputs(jax.random.PRNGKey(0), B, S, enc_hid, dec_hid, attn_dim)
    out = jax.block_until_ready(attention_forward(dec_h, enc, w, b))
    ref = attention_reference(dec_h, enc, w, b)
    assert out.shape == (B, S)
    assert jnp.allclose(out, ref, atol=1e-5, rtol=1e-5), "mismatch vs reference (small)"
    assert jnp.allclose(jnp.sum(out, axis=1), jnp.ones((B,)), atol=1e-5)

    # Larger shapes: exercises multi-tile S pipelining, src-len padding/masking and
    # ragged batch blocks (B=10 with BT=8), all in f32.
    B2, S2, enc_hid2, dec_hid2, attn_dim2 = 10, 300, 32, 32, 64
    dec_h2, enc2, w2, b2 = make_inputs(jax.random.PRNGKey(1), B2, S2, enc_hid2, dec_hid2,
                                       attn_dim2)
    out2 = jax.block_until_ready(attention_forward(dec_h2, enc2, w2, b2, s_tile=128))
    ref2 = attention_reference(dec_h2, enc2, w2, b2)
    assert out2.shape == (B2, S2)
    assert jnp.allclose(out2, ref2, atol=1e-5, rtol=1e-4), "mismatch vs reference (large)"
    assert jnp.allclose(jnp.sum(out2, axis=1), jnp.ones((B2,)), atol=1e-5)

    # bf16 MXU-input path (v6e/v7x optimization); accumulation + softmax stay f32.
    out3 = jax.block_until_ready(
        attention_forward(dec_h2, enc2, w2, b2, s_tile=128, use_bf16_matmul=True))
    assert out3.shape == (B2, S2)
    assert jnp.allclose(jnp.sum(out3, axis=1), jnp.ones((B2,)), atol=1e-3)

    print("KERNEL_OK")
</pallas_src>

<mosaic_0001>
module attributes {stable_mosaic.version = 11 : i64} {
  func.func @_attention_kernel(%arg0: i32, %arg1: i32, %arg2: memref<2x32xf32, #tpu.memory_space<vmem>>, %arg3: memref<8x64xf32, #tpu.memory_space<vmem>>, %arg4: memref<32x32xf32, #tpu.memory_space<vmem>>, %arg5: memref<2x8xf32, #tpu.memory_space<vmem>>, %arg6: memref<8x2xf32, #tpu.memory_space<vmem>>) attributes {dimension_semantics = [#tpu.dimension_semantics<parallel>, #tpu.dimension_semantics<arbitrary>], iteration_bounds = array<i64: 1, 1>, scalar_prefetch = 0 : i64, scratch_operands = 1 : i64, tpu.core_type = #tpu.core_type<tc>, window_params = [{transform_indices = @transform_0, window_bounds = array<i64: 2, 32>}, {transform_indices = @transform_1, window_bounds = array<i64: 8, 64>}, {pipeline_mode = #tpu.pipeline_mode<synchronous>, transform_indices = @transform_2, window_bounds = array<i64: 32, 32>}, {transform_indices = @transform_3, window_bounds = array<i64: 2, 8>}]} {
    %c0 = arith.constant 0 : index
    %c0_0 = arith.constant 0 : index
    %0 = vector.load %arg4[%c0, %c0_0] : memref<32x32xf32, #tpu.memory_space<vmem>>, vector<32x32xf32>
    %c0_1 = arith.constant 0 : index
    %c0_2 = arith.constant 0 : index
    %1 = vector.load %arg3[%c0_1, %c0_2] : memref<8x64xf32, #tpu.memory_space<vmem>>, vector<8x32xf32>
    %cst = arith.constant dense<0.000000e+00> : vector<8x32xf32>
    %2 = tpu.matmul %1, %0, %cst {dimension_numbers = #tpu.dot_dimension_numbers<[1], [0], [0], [1], [0, 0, 1, 1], [], []>} : vector<8x32xf32>, vector<32x32xf32>, vector<8x32xf32> -> vector<8x32xf32>
    %c0_3 = arith.constant 0 : index
    %c0_4 = arith.constant 0 : index
    %3 = vector.load %arg2[%c0_3, %c0_4] : memref<2x32xf32, #tpu.memory_space<vmem>>, vector<1x32xf32>
    %4 = vector.broadcast %3 : vector<1x32xf32> to vector<8x32xf32>
    %5 = arith.addf %2, %4 : vector<8x32xf32>
    %6 = math.tanh %5 : vector<8x32xf32>
    %cst_5 = arith.constant dense<0.000000e+00> : vector<8xf32>
    %7 = vector.multi_reduction <add>, %6, %cst_5 [1] : vector<8x32xf32> to vector<8xf32>
    %8 = vector.shape_cast %7 : vector<8xf32> to vector<8x1xf32>
    %c0_6 = arith.constant 0 : index
    %c32 = arith.constant 32 : index
    %9 = vector.load %arg3[%c0_6, %c32] : memref<8x64xf32, #tpu.memory_space<vmem>>, vector<8x32xf32>
    %cst_7 = arith.constant dense<0.000000e+00> : vector<8x32xf32>
    %10 = tpu.matmul %9, %0, %cst_7 {dimension_numbers = #tpu.dot_dimension_numbers<[1], [0], [0], [1], [0, 0, 1, 1], [], []>} : vector<8x32xf32>, vector<32x32xf32>, vector<8x32xf32> -> vector<8x32xf32>
    %c1 = arith.constant 1 : index
    %c0_8 = arith.constant 0 : index
    %11 = vector.load %arg2[%c1, %c0_8] : memref<2x32xf32, #tpu.memory_space<vmem>>, vector<1x32xf32>
    %12 = vector.broadcast %11 : vector<1x32xf32> to vector<8x32xf32>
    %13 = arith.addf %10, %12 : vector<8x32xf32>
    %14 = math.tanh %13 : vector<8x32xf32>
    %cst_9 = arith.constant dense<0.000000e+00> : vector<8xf32>
    %15 = vector.multi_reduction <add>, %14, %cst_9 [1] : vector<8x32xf32> to vector<8xf32>
    %16 = vector.shape_cast %15 : vector<8xf32> to vector<8x1xf32>
    %17 = tpu.concatenate %8, %16 in 1 : vector<8x1xf32>, vector<8x1xf32> -> vector<8x2xf32>
    %c8_i32 = arith.constant 8 : i32
    %18 = arith.muli %arg1, %c8_i32 : i32
    %19 = tpu.assume_multiple %18, 8 : i32
    %20 = arith.index_cast %19 : i32 to index
    %c0_10 = arith.constant 0 : index
    %21 = vector.load %arg6[%20, %c0_10] : memref<8x2xf32, #tpu.memory_space<vmem>>, vector<8x2xf32>
    tpu.vector_store %arg6[%20, %c0_10], %17 {strides = array<i32>} : memref<8x2xf32, #tpu.memory_space<vmem>>, vector<8x2xf32>,
    %c0_i32 = arith.constant 0 : i32
    %22 = arith.cmpi eq, %arg1, %c0_i32 : i32
    %23 = arith.extui %22 : i1 to i32
    %c0_i32_11 = arith.constant 0 : i32
    %24 = arith.cmpi ne, %23, %c0_i32_11 : i32
    scf.if %24 {
      %c0_12 = arith.constant 0 : index
      %c0_13 = arith.constant 0 : index
      %25 = vector.load %arg6[%c0_12, %c0_13] : memref<8x2xf32, #tpu.memory_space<vmem>>, vector<8x2xf32>
      %cst_14 = arith.constant dense<0xFF800000> : vector<2xf32>
      %26 = vector.multi_reduction <maximumf>, %25, %cst_14 [0] : vector<8x2xf32> to vector<2xf32>
      %27 = vector.shape_cast %26 : vector<2xf32> to vector<1x2xf32>
      %28 = vector.broadcast %27 : vector<1x2xf32> to vector<8x2xf32>
      %29 = arith.subf %25, %28 : vector<8x2xf32>
      %30 = math.exp %29 : vector<8x2xf32>
      %cst_15 = arith.constant dense<0.000000e+00> : vector<2xf32>
      %31 = vector.multi_reduction <add>, %30, %cst_15 [0] : vector<8x2xf32> to vector<2xf32>
      %32 = vector.shape_cast %31 : vector<2xf32> to vector<1x2xf32>
      %33 = tpu.reciprocal %32 : vector<1x2xf32> -> vector<1x2xf32>
      %34 = vector.broadcast %33 : vector<1x2xf32> to vector<8x2xf32>
      %35 = arith.mulf %30, %34 : vector<8x2xf32>
      %36 = tpu.transpose %35, [1, 0] : vector<8x2xf32> -> vector<2x8xf32>
      %c0_16 = arith.constant 0 : index
      %c0_17 = arith.constant 0 : index
      %37 = vector.load %arg5[%c0_16, %c0_17] : memref<2x8xf32, #tpu.memory_space<vmem>>, vector<2x8xf32>
      tpu.vector_store %arg5[%c0_16, %c0_17], %36 {strides = array<i32>} : memref<2x8xf32, #tpu.memory_space<vmem>>, vector<2x8xf32>,
    } else {
    }
    return
  }
  func.func @transform_0(%arg0: i32, %arg1: i32) -> (i32, i32) {
    %c0_i32 = arith.constant 0 : i32
    %c0_i32_0 = arith.constant 0 : i32
    return %arg0, %c0_i32 : i32, i32
  }
  func.func @transform_1(%arg0: i32, %arg1: i32) -> (i32, i32) {
    %c0_i32 = arith.constant 0 : i32
    return %arg1, %arg0 : i32, i32
  }
  func.func @transform_2(%arg0: i32, %arg1: i32) -> (i32, i32) {
    %c0_i32 = arith.constant 0 : i32
    %c0_i32_0 = arith.constant 0 : i32
    %c0_i32_1 = arith.constant 0 : i32
    return %c0_i32, %c0_i32_0 : i32, i32
  }
  func.func @transform_3(%arg0: i32, %arg1: i32) -> (i32, i32) {
    %c0_i32 = arith.constant 0 : i32
    %c0_i32_0 = arith.constant 0 : i32
    return %arg0, %c0_i32 : i32, i32
  }
}

</mosaic_0001>

<bundles_post_ra>
// kernel: tpu_custom_call.1
= control target key start
LH: loop header
LB: loop body
LE: loop exit
PB: predicated region body
PF: predicated region fallthrough
CT: control target
= control target key end

     0   :  { %8 = vsyncpa [#allocation4], 0  ;;  %s490_s0 = inlined_call_operand.hbm [shape: f32[2,32], index: 0, kind: input, shape index: {}]   ;;  %s491_s1 = inlined_call_operand.hbm [shape: f32[8,64], index: 1, kind: input, shape index: {}]   ;;  %s492_s2 = inlined_call_operand.hbm [shape: f32[32,32], index: 2, kind: input, shape index: {}]   ;;  %s493_s3 = inlined_call_operand.hbm [shape: f32[2,8], index: 3, kind: output, shape index: {}]  }
   0x1   :  { %9 = vsyncpa [#allocation7], 0 }
   0x2   :  { %10 = vsyncpa [#allocation5], 0  ;;  %s442_s12 = smov [#allocation6]   ;;  %s443_s14 = smov [#allocation3]  }
   0x3   :  { %s27_s13 = sshll.u32 %s442_s12, 4  ;;  %s17_s15 = sshll.u32 %s443_s14, 4  ;;  %s28_s13 = int_to_ptr.vmem [resolvable:$true] %s27_s13  ;;  %s18_s15 = int_to_ptr.vmem [resolvable:$true] %s17_s15 }
   0x4   :  { %s364_s16 = scalar_lea.vmem %s28_s13, 128  ;;  %p369_p1 = scmp.lt.s32.totalorder %s28_s13, %s28_s13 }
   0x5   :  { %p365_p0 = scmp.ne.s32.totalorder %s28_s13, %s364_s16  ;;  %p370_p2 = scmp.lt.s32.totalorder %s364_s16, %s364_s16 }
   0x7   :  { %p371_p3 = por %p370_p2, %p369_p1 }
   0x9   :  { %p372_p4 = pnand %p371_p3, %p365_p0 }
   0xb   :  { %375 = shalt.err (!%p372_p4)
}
   0xc   :  { %30 = dma.hbm_to_vmem [thread:$0]  %s491_s1, 128, %s28_s13, [#allocation7]  }
   0xd   :  { %s384_s19 = scalar_lea.vmem %s18_s15, 32  ;;  %p389_p6 = scmp.lt.s32.totalorder %s18_s15, %s18_s15 }
   0xe   :  { %p385_p5 = scmp.ne.s32.totalorder %s18_s15, %s384_s19  ;;  %p390_p7 = scmp.lt.s32.totalorder %s384_s19, %s384_s19 }
  0x10   :  { %p391_p8 = por %p390_p7, %p389_p6 }
  0x12   :  { %p392_p9 = pnand %p391_p8, %p385_p5 }
  0x14   :  { %395 = shalt.err (!%p392_p9)
}
  0x15   :  { %20 = dma.hbm_to_vmem [thread:$0]  %s490_s0, 32, %s18_s15, [#allocation4]  }
  0x16   :  { %s444_s22 = smov [#allocation8]  }
  0x17   :  { %s36_s23 = sshll.u32 %s444_s22, 4  ;;  %s37_s23 = int_to_ptr.vmem [resolvable:$true] %s36_s23 }
  0x18   :  { %s404_s24 = scalar_lea.vmem %s37_s23, 512  ;;  %p409_p11 = scmp.lt.s32.totalorder %s37_s23, %s37_s23 }
  0x19   :  { %p405_p10 = scmp.ne.s32.totalorder %s37_s23, %s404_s24  ;;  %p410_p12 = scmp.lt.s32.totalorder %s404_s24, %s404_s24 }
  0x1b   :  { %p411_p13 = por %p410_p12, %p409_p11 }
  0x1d   :  { %p412_p0 = pnand %p411_p13, %p405_p10 }
  0x1f   :  { %415 = shalt.err (!%p412_p0)
}
  0x20   :  { %s445_s1 = smov 128   ;;  %s446_s25 = smov 8  }
  0x21   :  { %42 = dma.hbm_to_vmem [thread:$0]  %s492_s2, 512, %s37_s23, [#allocation7], %s445_s1, %s445_s1, %s446_s25  }
  0x22   :  { %436 = dma.done.wait [#allocation4], 32  }
  0x23   :  { %437 = vsyncadd [#allocation4], 4294967264 }
  0x24   :  { %438 = dma.done.wait [#allocation7], 640  }
  0x25   :  { %439 = vsyncadd [#allocation7], 4294966656  ;;  %v447_v0 = vmov 0.0   ;;  %vm448_vm0 = vmmov 0   ;;  %v56_v1 = vld [vmem:[#allocation6] sm:$0xff]  ;;  %v54_v3 = vld [vmem:[#allocation8 + $0x10] sm:$0xff] }
  0x26   :  { %317 = vmatprep.subr.mxu0 %v447_v0  ;;  %328 = vmatprep.subr.mxu1 %v447_v0  ;;  %v55_v2 = vld [vmem:[#allocation8 + $0x18] sm:$0xff]  ;;  %s449_s0 = smov 96   ;;  %v53_v4 = vld [vmem:[#allocation8 + $0x8] sm:$0xff]  ;;  %v52_v5 = vld [vmem:[#allocation8] sm:$0xff]  ;;  %vm62_vm1 = vcmask 261120   ;;  %vm223_vm2 = vcmask 7168  }
  0x27   :  { %325 = vmatprep.mubr.msk.f32.mxu0 %vm448_vm0, %v447_v0  ;;  %336 = vmatprep.mubr.msk.f32.mxu1 %vm448_vm0, %v447_v0  ;;  %v303_v7 = vld [vmem:[#allocation3] ss:$0 sm:$0xff]  ;;  %v305_v13 = vld [vmem:[#allocation3 + $0x1] ss:$0 sm:$0xff]  ;;  %vm227_vm3 = vcmask 15360   ;;  %s450_s2 = smov [#allocation9]  }
  0x28   :  { %145 = vrot.lane.b32.xlu0 %v56_v1, %s449_s0  ;;  %318 = vmatpush3.msra.mxu0 %v55_v2  ;;  %s293_s28 = sshll.u32 %s450_s2, 4  ;;  %vm285_vm4 = vcmask 58368   ;;  %s294_s28 = int_to_ptr.vmem [resolvable:$true] %s293_s28 }
  0x29   :  { %319 = vmatprep.subr.mxu0 %v447_v0  ;;  %329 = vmatpush3.msra.mxu1 %v55_v2  ;;  %s416_s29 = scalar_lea.vmem %s294_s28, 32  ;;  %p421_p2 = scmp.lt.s32.totalorder %s294_s28, %s294_s28 }
  0x2a   :  { %320 = vmatpush3.msra.mxu0 %v54_v3  ;;  %330 = vmatprep.subr.mxu1 %v447_v0  ;;  %p417_p1 = scmp.ne.s32.totalorder %s294_s28, %s416_s29  ;;  %p422_p3 = scmp.lt.s32.totalorder %s416_s29, %s416_s29 }
  0x2b   :  { %321 = vmatprep.subr.mxu0 %v447_v0  ;;  %331 = vmatpush3.msra.mxu1 %v54_v3 }
  0x2c   :  { %322 = vmatpush3.msra.mxu0 %v53_v4  ;;  %332 = vmatprep.subr.mxu1 %v447_v0  ;;  %p423_p4 = por %p422_p3, %p421_p2 }
  0x2d   :  { %323 = vmatprep.subr.mxu0 %v447_v0  ;;  %333 = vmatpush3.msra.mxu1 %v53_v4 }
  0x2e   :  { %324 = vmatpush3.msra.mxu0 %v52_v5  ;;  %334 = vmatprep.subr.mxu1 %v447_v0  ;;  %p424_p5 = pnand %p423_p4, %p417_p1 }
  0x2f   :  { %326 = vmatmul.mubr.msk.f32.vlgmr.msra.gmra.mxu0 %vm62_vm1, %v56_v1  ;;  %335 = vmatpush3.msra.mxu1 %v52_v5 }
  0x9a   :  { %v146_v6 = vpop.permute.xlu0 %145 }
  0x9b   :  { %337 = vmatmul.mubr.msk.f32.vlgmr.msra.gmra.mxu1 %vm62_vm1, %v146_v6 }
  0xef   :  { %v132_v8 = vpop.f32.mrf.mxu0 }
  0xf0   :  { %v133_v9 = vadd.f32 %v303_v7, %v132_v8 }
  0xf1   :  { %v327_v10 = vpop.f32.mrf.mxu0 }
  0xf2   :  { %348 = vtanh.f32 %v133_v9 }
  0xff   :  { %v349_v11 = vpop.eup %348 }
 0x100   :  { %v137_v12 = vsel %vm62_vm1, %v349_v11, 0.0 }
 0x101   :  { %138 = vadd.xlane.f32.xlu0 %v137_v12 }
 0x15b   :  { %v215_v14 = vpop.f32.mrf.mxu1 }
 0x15c   :  { %v216_v15 = vadd.f32 %v305_v13, %v215_v14 }
 0x15d   :  { %v338_v16 = vpop.f32.mrf.mxu1 }
 0x15e   :  { %350 = vtanh.f32 %v216_v15 }
 0x16b   :  { %v351_v17 = vpop.eup %350 }
 0x16c   :  { %v220_v18 = vsel %vm62_vm1, %v351_v17, 0.0 }
 0x16d   :  { %221 = vadd.xlane.f32.xlu1 %v220_v18 }
 0x18a   :  { %v139_v19 = vpop.xlane.xlu0 %138 }
 0x1f6   :  { %v222_v20 = vpop.xlane.xlu1 %221 }
 0x1f7   :  { %v224_v21 = vsel %vm223_vm2, %v139_v19, %v222_v20 }
 0x1f8   :  { %228 = vst.msk [vmem:[#allocation2] sm:$0xff] %vm227_vm3, %v224_v21 }
 0x1ff   :  { %v233_v22 = vld [vmem:[#allocation2] sm:$0xff] }
 0x200   :  { %v234_v23 = vsel %vm227_vm3, %v233_v22, -inf }
 0x201   :  { %v235_v24 = vrot.slane %v234_v23, 4 }
 0x203   :  { %v236_v25 = vmax.f32 %v234_v23, %v235_v24 }
 0x205   :  { %v237_v26 = vrot.slane %v236_v25, 2 }
 0x207   :  { %v238_v27 = vmax.f32 %v236_v25, %v237_v26 }
 0x209   :  { %v239_v28 = vrot.slane %v238_v27, 1 }
 0x20b   :  { %v240_v29 = vmax.f32 %v238_v27, %v239_v28 }
 0x20d   :  { %v241_v30 = vsub.f32 %v233_v22, %v240_v29 }
 0x20f   :  { %v242_v31 = vmul.f32 1.442695, %v241_v30 }
 0x211   :  { %352 = vpow2.f32 %v242_v31 }
 0x21e   :  { %v353_v32 = vpop.eup %352 }
 0x21f   :  { %v244_v33 = vsel %vm227_vm3, %v353_v32, 0.0 }
 0x220   :  { %v245_v34 = vrot.slane %v244_v33, 4 }
 0x222   :  { %v246_v35 = vadd.f32 %v245_v34, %v244_v33 }
 0x224   :  { %v247_v36 = vrot.slane %v246_v35, 2 }
 0x226   :  { %v248_v37 = vadd.f32 %v247_v36, %v246_v35 }
 0x228   :  { %v249_v38 = vrot.slane %v248_v37, 1 }
 0x22a   :  { %v250_v39 = vadd.f32 %v249_v38, %v248_v37 }
 0x22c   :  { %354 = vrcp.f32 %v250_v39 }
 0x239   :  { %v355_v40 = vpop.eup %354 }
 0x23a   :  { %v252_v41 = vmul.f32 %v355_v40, %v353_v32 }
 0x23c   :  { %253 = vxpose.xlu1.b32.start.end [1/1] (short) (narrow) %v252_v41, 8 }
 0x2b8   :  { %v269_v42 = vpop.trf.xlu1 }
 0x2b9   :  { %286 = vst.msk [vmem:[#allocation9] sm:$0x3] %vm285_vm4, %v269_v42 }
 0x2ba   :  { %427 = shalt.err (!%p424_p5)
}
 0x2bb   :  { %296 = dma.vmem_to_hbm [thread:$0]  %s294_s28, 32, %s493_s3, [#allocation5]  }
 0x2bc   :  { %440 = dma.done.wait [#allocation5], 32  }
 0x2bd   :  { %441 = vsyncadd [#allocation5], 4294967264 }
 0x2be   :  { %300 = vsyncpa [#allocation4], 1 }
 0x2bf   :  { %301 = vsyncpa [#allocation7], 1 }
 0x2c0   :  { %302 = vsyncpa [#allocation5], 1 }

</bundles_post_ra>
